<compile_context>
chip_gen: v5e
topology: v5e:2x2
jax: 0.10.0
libtpu: 0.0.40
codegen_flags: <defaults>
</compile_context>

<pallas_src>
import math
from functools import partial

import jax
import jax.numpy as jnp
from jax.experimental import pallas as pl
from jax.experimental.pallas import tpu as pltpu

LANE = 128
_TILE_CAP = 2048  # rows per batch tile (per-tile VMEM footprint ~7 MiB)


def _round_up(n, m):
    return ((n + m - 1) // m) * m


def _cdiv(a, b):
    return -(-a // b)


def _choose_batch_tiling(B):
    """Pick (tile_b, b_pad): >=2 grid steps when possible (v7x megacore),
    tile capped at _TILE_CAP, tail padding bounded by 8 rows per tile."""
    b8 = _round_up(max(B, 1), 8)
    if b8 <= 8:
        return b8, b8
    n_tiles = max(2, _cdiv(b8, _TILE_CAP))
    tile_b = _round_up(_cdiv(b8, n_tiles), 8)
    return tile_b, n_tiles * tile_b


def _dqn_kernel(x_ref, w1_ref, w2_ref, w3_ref, w4_ref, bias_ref, o_ref,
                *, h1, h2, h3p, outp):
    """Fused 4-layer MLP: (Linear -> ReLU) x3 -> Linear, BN folded into weights."""
    x = x_ref[...]                               # bf16 [tile_b, state_size]
    b = bias_ref[...]                            # f32 [8, 256] packed bias rows

    # Layer 1
    h = jnp.dot(x, w1_ref[...], preferred_element_type=jnp.float32)
    h = jnp.maximum(h + b[0:1, :h1], 0.0)

    # Layer 2 (BN1 folded into w2/b2)
    h = jnp.dot(h.astype(jnp.bfloat16), w2_ref[...],
                preferred_element_type=jnp.float32)
    h = jnp.maximum(h + b[1:2, :h2], 0.0)

    # Layer 3 (BN2 folded into w3/b3), hidden3 padded to 128 lanes
    h = jnp.dot(h.astype(jnp.bfloat16), w3_ref[...],
                preferred_element_type=jnp.float32)
    h = jnp.maximum(h + b[2:3, :h3p], 0.0)

    # Output head (BN3 folded into w4/b4), 128 lanes -> lane-dense bf16 store
    q = jnp.dot(h.astype(jnp.bfloat16), w4_ref[...],
                preferred_element_type=jnp.float32)
    o_ref[...] = (q + b[3:4, :outp]).astype(o_ref.dtype)


def epyc_dqn_forward(x, params):
    """x: [B, state_size] float32. Returns [B, action_size] float32 Q-values."""
    B, state_size = x.shape
    w1, w2, w3, w4 = params["w1"], params["w2"], params["w3"], params["w4"]
    bias = params["bias"]
    action_size = params["action_size"]

    h1 = w1.shape[1]
    h2 = w2.shape[1]
    h3p = w3.shape[1]     # padded hidden3 (128)
    outp = w4.shape[1]    # padded action dim (128)

    tile_b, b_pad = _choose_batch_tiling(B)

    # Single cheap wrapper op: cast to bf16 (+ batch pad only if needed).
    xb = x.astype(jnp.bfloat16)
    if b_pad != B:
        xb = jnp.pad(xb, ((0, b_pad - B), (0, 0)))

    grid = (b_pad // tile_b,)
    kernel = partial(_dqn_kernel, h1=h1, h2=h2, h3p=h3p, outp=outp)

    flops = 2 * b_pad * (state_size * h1 + h1 * h2 + h2 * h3p + h3p * outp)
    bytes_accessed = (b_pad * state_size * 2          # x in (bf16)
                      + b_pad * outp * 2              # out (bf16)
                      + 2 * (w1.size + w2.size + w3.size + w4.size)
                      + bias.size * 4)

    out = pl.pallas_call(
        kernel,
        out_shape=jax.ShapeDtypeStruct((b_pad, outp), jnp.bfloat16),
        grid=grid,
        in_specs=[
            # x: tiled over batch; last dim == full array dim (unpadded state)
            pl.BlockSpec((tile_b, state_size), lambda i: (i, 0)),
            # weights / bias: full-array blocks, constant index -> VMEM-resident
            pl.BlockSpec(w1.shape, lambda i: (0, 0)),
            pl.BlockSpec(w2.shape, lambda i: (0, 0)),
            pl.BlockSpec(w3.shape, lambda i: (0, 0)),
            pl.BlockSpec(w4.shape, lambda i: (0, 0)),
            pl.BlockSpec(bias.shape, lambda i: (0, 0)),
        ],
        out_specs=pl.BlockSpec((tile_b, outp), lambda i: (i, 0)),
        compiler_params=pltpu.CompilerParams(
            dimension_semantics=("parallel",),
            vmem_limit_bytes=32 * 1024 * 1024),
        cost_estimate=pl.CostEstimate(
            flops=flops, transcendentals=0, bytes_accessed=bytes_accessed),
    )(xb, w1, w2, w3, w4, bias)

    return out[:B, :action_size].astype(jnp.float32)


def _xavier_uniform(key, fan_in, fan_out):
    # nn.init.xavier_uniform_ for a Linear weight [out, in]; we build the
    # transposed [in, out] layout directly (distributionally equivalent).
    a = math.sqrt(6.0 / (fan_in + fan_out))
    return jax.random.uniform(key, (fan_in, fan_out), jnp.float32, -a, a)


def init_params(key, state_size, action_size, epyc_cores=64):
    h1 = min(epyc_cores * 4, 256)
    h2 = min(epyc_cores * 2, 128)
    h3 = min(epyc_cores, 64)
    eps = 1e-5

    k1, k2, k3, k4 = jax.random.split(key, 4)

    w1 = _xavier_uniform(k1, state_size, h1)
    b1 = jnp.full((h1,), 0.01, jnp.float32)
    w2 = _xavier_uniform(k2, h1, h2)
    b2 = jnp.full((h2,), 0.01, jnp.float32)
    w3 = _xavier_uniform(k3, h2, h3)
    b3 = jnp.full((h3,), 0.01, jnp.float32)
    w4 = _xavier_uniform(k4, h3, action_size)
    b4 = jnp.full((action_size,), 0.01, jnp.float32)

    def bn_affine(n):
        # gamma=1, beta=0, running_mean=0, running_var=1 (fresh BatchNorm1d)
        gamma = jnp.ones((n,), jnp.float32)
        beta = jnp.zeros((n,), jnp.float32)
        mean = jnp.zeros((n,), jnp.float32)
        var = jnp.ones((n,), jnp.float32)
        scale = gamma / jnp.sqrt(var + eps)
        shift = beta - mean * scale
        return scale, shift

    s1, t1 = bn_affine(h1)
    s2, t2 = bn_affine(h2)
    s3, t3 = bn_affine(h3)

    # Fold eval-mode BN (which follows ReLU) into the *next* Linear:
    #   (relu_out * s + t) @ W + b  ==  relu_out @ (diag(s) W) + (t @ W + b)
    w2f = s1[:, None] * w2
    b2f = t1 @ w2 + b2
    w3f = s2[:, None] * w3
    b3f = t2 @ w3 + b3
    w4f = s3[:, None] * w4
    b4f = t3 @ w4 + b4

    # Lane-dense padding of hidden3 / action dims only (zeros: neutral).
    # The state (K) dim is intentionally left unpadded.
    h3p = _round_up(h3, LANE)
    outp = _round_up(max(action_size, 1), LANE)

    w3p = jnp.zeros((h2, h3p), jnp.float32).at[:, :h3].set(w3f)
    w4p = jnp.zeros((h3p, outp), jnp.float32).at[:h3, :action_size].set(w4f)

    # Pack all biases into one [8, 256] f32 array (rows 0..3 used).
    bias = jnp.zeros((8, 256), jnp.float32)
    bias = bias.at[0, :h1].set(b1)
    bias = bias.at[1, :h2].set(b2f)
    bias = bias.at[2, :h3].set(b3f)
    bias = bias.at[3, :action_size].set(b4f)

    return {
        "w1": w1.astype(jnp.bfloat16),      # [state_size, h1] (unpadded K)
        "w2": w2f.astype(jnp.bfloat16),
        "w3": w3p.astype(jnp.bfloat16),
        "w4": w4p.astype(jnp.bfloat16),
        "bias": bias,
        "action_size": action_size,
        # f32 reference copies (not passed to the kernel)
        "_ref": dict(w1=w1, b1=b1, s1=s1, t1=t1, w2=w2, b2=b2, s2=s2, t2=t2,
                     w3=w3, b3=b3, s3=s3, t3=t3, w4=w4, b4=b4),
    }


def reference_forward(x, r):
    """Pure-JAX f32 reference: Linear->ReLU->BN(eval)->Dropout(id) x3 -> Linear."""
    h = jnp.maximum(x @ r["w1"] + r["b1"], 0.0) * r["s1"] + r["t1"]
    h = jnp.maximum(h @ r["w2"] + r["b2"], 0.0) * r["s2"] + r["t2"]
    h = jnp.maximum(h @ r["w3"] + r["b3"], 0.0) * r["s3"] + r["t3"]
    return h @ r["w4"] + r["b4"]


if __name__ == "__main__":
    key = jax.random.PRNGKey(0)
    k_x, k_p = jax.random.split(key)

    batch = 2
    state_size = 32
    action_size = 8

    x = jax.random.normal(k_x, (batch, state_size), jnp.float32)
    params = init_params(k_p, state_size, action_size, epyc_cores=64)

    q_values = epyc_dqn_forward(x, params)
    jax.block_until_ready(q_values)

    assert q_values.shape == (batch, action_size)
    assert q_values.dtype == jnp.float32

    # bf16-matmul kernel (bf16 output store) vs f32 reference: loose tolerance.
    q_ref = reference_forward(x, params["_ref"])
    max_err = float(jnp.max(jnp.abs(q_values - q_ref)))
    assert max_err < 5e-2, f"max abs err {max_err}"

    print("KERNEL_OK")
</pallas_src>

<mosaic_0001>
module attributes {stable_mosaic.version = 11 : i64} {
  func.func @_dqn_kernel(%arg0: i32, %arg1: memref<8x32xbf16, #tpu.memory_space<vmem>>, %arg2: memref<32x256xbf16, #tpu.memory_space<vmem>>, %arg3: memref<256x128xbf16, #tpu.memory_space<vmem>>, %arg4: memref<128x128xbf16, #tpu.memory_space<vmem>>, %arg5: memref<128x128xbf16, #tpu.memory_space<vmem>>, %arg6: memref<8x256xf32, #tpu.memory_space<vmem>>, %arg7: memref<8x128xbf16, #tpu.memory_space<vmem>>) attributes {dimension_semantics = [#tpu.dimension_semantics<parallel>], iteration_bounds = array<i64: 1>, scalar_prefetch = 0 : i64, scratch_operands = 0 : i64, tpu.core_type = #tpu.core_type<tc>, window_params = [{transform_indices = @transform_0, window_bounds = array<i64: 8, 32>}, {pipeline_mode = #tpu.pipeline_mode<synchronous>, transform_indices = @transform_1, window_bounds = array<i64: 32, 256>}, {pipeline_mode = #tpu.pipeline_mode<synchronous>, transform_indices = @transform_2, window_bounds = array<i64: 256, 128>}, {pipeline_mode = #tpu.pipeline_mode<synchronous>, transform_indices = @transform_3, window_bounds = array<i64: 128, 128>}, {pipeline_mode = #tpu.pipeline_mode<synchronous>, transform_indices = @transform_4, window_bounds = array<i64: 128, 128>}, {pipeline_mode = #tpu.pipeline_mode<synchronous>, transform_indices = @transform_5, window_bounds = array<i64: 8, 256>}, {transform_indices = @transform_6, window_bounds = array<i64: 8, 128>}]} {
    %c0 = arith.constant 0 : index
    %c0_0 = arith.constant 0 : index
    %0 = vector.load %arg1[%c0, %c0_0] : memref<8x32xbf16, #tpu.memory_space<vmem>>, vector<8x32xbf16>
    %c0_1 = arith.constant 0 : index
    %c0_2 = arith.constant 0 : index
    %1 = vector.load %arg6[%c0_1, %c0_2] : memref<8x256xf32, #tpu.memory_space<vmem>>, vector<8x256xf32>
    %c0_3 = arith.constant 0 : index
    %c0_4 = arith.constant 0 : index
    %2 = vector.load %arg2[%c0_3, %c0_4] : memref<32x256xbf16, #tpu.memory_space<vmem>>, vector<32x256xbf16>
    %cst = arith.constant dense<0.000000e+00> : vector<8x256xf32>
    %3 = tpu.matmul %0, %2, %cst {dimension_numbers = #tpu.dot_dimension_numbers<[1], [0], [0], [1], [0, 0, 1, 1], [], []>} : vector<8x32xbf16>, vector<32x256xbf16>, vector<8x256xf32> -> vector<8x256xf32>
    %4 = vector.extract_strided_slice %1 {offsets = [0, 0], sizes = [1, 256], strides = [1, 1]} : vector<8x256xf32> to vector<1x256xf32>
    %5 = vector.broadcast %4 : vector<1x256xf32> to vector<8x256xf32>
    %6 = arith.addf %3, %5 : vector<8x256xf32>
    %cst_5 = arith.constant 0.000000e+00 : f32
    %7 = vector.broadcast %cst_5 : f32 to vector<8x256xf32>
    %8 = arith.maximumf %6, %7 : vector<8x256xf32>
    %9 = arith.truncf %8 : vector<8x256xf32> to vector<8x256xbf16>
    %c0_6 = arith.constant 0 : index
    %c0_7 = arith.constant 0 : index
    %10 = vector.load %arg3[%c0_6, %c0_7] : memref<256x128xbf16, #tpu.memory_space<vmem>>, vector<256x128xbf16>
    %cst_8 = arith.constant dense<0.000000e+00> : vector<8x128xf32>
    %11 = tpu.matmul %9, %10, %cst_8 {dimension_numbers = #tpu.dot_dimension_numbers<[1], [0], [0], [1], [0, 0, 1, 1], [], []>} : vector<8x256xbf16>, vector<256x128xbf16>, vector<8x128xf32> -> vector<8x128xf32>
    %12 = vector.extract_strided_slice %1 {offsets = [1, 0], sizes = [1, 128], strides = [1, 1]} : vector<8x256xf32> to vector<1x128xf32>
    %13 = vector.broadcast %12 : vector<1x128xf32> to vector<8x128xf32>
    %14 = arith.addf %11, %13 : vector<8x128xf32>
    %cst_9 = arith.constant 0.000000e+00 : f32
    %15 = vector.broadcast %cst_9 : f32 to vector<8x128xf32>
    %16 = arith.maximumf %14, %15 : vector<8x128xf32>
    %17 = arith.truncf %16 : vector<8x128xf32> to vector<8x128xbf16>
    %c0_10 = arith.constant 0 : index
    %c0_11 = arith.constant 0 : index
    %18 = vector.load %arg4[%c0_10, %c0_11] : memref<128x128xbf16, #tpu.memory_space<vmem>>, vector<128x128xbf16>
    %cst_12 = arith.constant dense<0.000000e+00> : vector<8x128xf32>
    %19 = tpu.matmul %17, %18, %cst_12 {dimension_numbers = #tpu.dot_dimension_numbers<[1], [0], [0], [1], [0, 0, 1, 1], [], []>} : vector<8x128xbf16>, vector<128x128xbf16>, vector<8x128xf32> -> vector<8x128xf32>
    %20 = vector.extract_strided_slice %1 {offsets = [2, 0], sizes = [1, 128], strides = [1, 1]} : vector<8x256xf32> to vector<1x128xf32>
    %21 = vector.broadcast %20 : vector<1x128xf32> to vector<8x128xf32>
    %22 = arith.addf %19, %21 : vector<8x128xf32>
    %cst_13 = arith.constant 0.000000e+00 : f32
    %23 = vector.broadcast %cst_13 : f32 to vector<8x128xf32>
    %24 = arith.maximumf %22, %23 : vector<8x128xf32>
    %25 = arith.truncf %24 : vector<8x128xf32> to vector<8x128xbf16>
    %c0_14 = arith.constant 0 : index
    %c0_15 = arith.constant 0 : index
    %26 = vector.load %arg5[%c0_14, %c0_15] : memref<128x128xbf16, #tpu.memory_space<vmem>>, vector<128x128xbf16>
    %cst_16 = arith.constant dense<0.000000e+00> : vector<8x128xf32>
    %27 = tpu.matmul %25, %26, %cst_16 {dimension_numbers = #tpu.dot_dimension_numbers<[1], [0], [0], [1], [0, 0, 1, 1], [], []>} : vector<8x128xbf16>, vector<128x128xbf16>, vector<8x128xf32> -> vector<8x128xf32>
    %28 = vector.extract_strided_slice %1 {offsets = [3, 0], sizes = [1, 128], strides = [1, 1]} : vector<8x256xf32> to vector<1x128xf32>
    %29 = vector.broadcast %28 : vector<1x128xf32> to vector<8x128xf32>
    %30 = arith.addf %27, %29 : vector<8x128xf32>
    %31 = arith.truncf %30 : vector<8x128xf32> to vector<8x128xbf16>
    %c0_17 = arith.constant 0 : index
    %c0_18 = arith.constant 0 : index
    %32 = vector.load %arg7[%c0_17, %c0_18] : memref<8x128xbf16, #tpu.memory_space<vmem>>, vector<8x128xbf16>
    tpu.vector_store %arg7[%c0_17, %c0_18], %31 {strides = array<i32>} : memref<8x128xbf16, #tpu.memory_space<vmem>>, vector<8x128xbf16>,
    return
  }
  func.func @transform_0(%arg0: i32) -> (i32, i32) {
    %c0_i32 = arith.constant 0 : i32
    %c0_i32_0 = arith.constant 0 : i32
    return %arg0, %c0_i32 : i32, i32
  }
  func.func @transform_1(%arg0: i32) -> (i32, i32) {
    %c0_i32 = arith.constant 0 : i32
    %c0_i32_0 = arith.constant 0 : i32
    %c0_i32_1 = arith.constant 0 : i32
    return %c0_i32, %c0_i32_0 : i32, i32
  }
  func.func @transform_2(%arg0: i32) -> (i32, i32) {
    %c0_i32 = arith.constant 0 : i32
    %c0_i32_0 = arith.constant 0 : i32
    %c0_i32_1 = arith.constant 0 : i32
    return %c0_i32, %c0_i32_0 : i32, i32
  }
  func.func @transform_3(%arg0: i32) -> (i32, i32) {
    %c0_i32 = arith.constant 0 : i32
    %c0_i32_0 = arith.constant 0 : i32
    %c0_i32_1 = arith.constant 0 : i32
    return %c0_i32, %c0_i32_0 : i32, i32
  }
  func.func @transform_4(%arg0: i32) -> (i32, i32) {
    %c0_i32 = arith.constant 0 : i32
    %c0_i32_0 = arith.constant 0 : i32
    %c0_i32_1 = arith.constant 0 : i32
    return %c0_i32, %c0_i32_0 : i32, i32
  }
  func.func @transform_5(%arg0: i32) -> (i32, i32) {
    %c0_i32 = arith.constant 0 : i32
    %c0_i32_0 = arith.constant 0 : i32
    %c0_i32_1 = arith.constant 0 : i32
    return %c0_i32, %c0_i32_0 : i32, i32
  }
  func.func @transform_6(%arg0: i32) -> (i32, i32) {
    %c0_i32 = arith.constant 0 : i32
    %c0_i32_0 = arith.constant 0 : i32
    return %arg0, %c0_i32 : i32, i32
  }
}

</mosaic_0001>

<bundles_post_ra>
// kernel: tpu_custom_call.1
= control target key start
LH: loop header
LB: loop body
LE: loop exit
PB: predicated region body
PF: predicated region fallthrough
CT: control target
= control target key end

     0   :  { %11 = vsyncpa [#allocation3], 0  ;;  %s953_s0 = inlined_call_operand.hbm [shape: bf16[8,32], index: 0, kind: input, shape index: {}]   ;;  %s954_s1 = inlined_call_operand.hbm [shape: bf16[32,256], index: 1, kind: input, shape index: {}]   ;;  %s955_s2 = inlined_call_operand.hbm [shape: bf16[256,128], index: 2, kind: input, shape index: {}]   ;;  %s956_s3 = inlined_call_operand.hbm [shape: bf16[128,128], index: 3, kind: input, shape index: {}]   ;;  %s957_s4 = inlined_call_operand.hbm [shape: bf16[128,128], index: 4, kind: input, shape index: {}]   ;;  %s958_s5 = inlined_call_operand.hbm [shape: f32[8,256], index: 5, kind: input, shape index: {}]   ;;  %s959_s6 = inlined_call_operand.hbm [shape: bf16[8,128], index: 6, kind: output, shape index: {}]  }
   0x1   :  { %12 = vsyncpa [#allocation6], 0 }
   0x2   :  { %13 = vsyncpa [#allocation9], 0 }
   0x3   :  { %14 = vsyncpa [#allocation12], 0  ;;  %s31_s23 = sshll.u32 %s954_s1, 4  ;;  %s32_s23 = int_to_ptr.hbm [resolvable:$true] %s31_s23 }
   0x4   :  { %15 = vsyncpa [#allocation4], 0  ;;  %s886_s24 = smov [#allocation5]   ;;  %s887_s26 = smov 128  }
   0x5   :  { %s33_s25 = sshll.u32 %s886_s24, 4  ;;  %s888_s27 = smov 8   ;;  %s34_s25 = int_to_ptr.vmem [resolvable:$true] %s33_s25 }
   0x6   :  { %39 = dma.hbm_to_vmem [thread:$0]  %s32_s23, 512, %s34_s25, [#allocation6], %s887_s26, %s887_s26, %s888_s27  }
   0x7   :  { %s57_s30 = sshll.u32 %s956_s3, 4  ;;  %s889_s7 = smov [#allocation8]   ;;  %s58_s30 = int_to_ptr.hbm [resolvable:$true] %s57_s30 }
   0x8   :  { %s59_s8 = sshll.u32 %s889_s7, 4  ;;  %s21_s11 = sshll.u32 %s953_s0, 4  ;;  %s60_s8 = int_to_ptr.vmem [resolvable:$true] %s59_s8  ;;  %s22_s11 = int_to_ptr.hbm [resolvable:$true] %s21_s11 }
   0x9   :  { %s890_s1 = smov 64   ;;  %s891_s12 = smov 4  }
   0xa   :  { %65 = dma.hbm_to_vmem [thread:$0]  %s58_s30, 1024, %s60_s8, [#allocation9], %s890_s1, %s890_s1, %s891_s12  }
   0xb   :  { %s44_s15 = sshll.u32 %s955_s2, 4  ;;  %s892_s16 = smov [#allocation2]   ;;  %s45_s15 = int_to_ptr.hbm [resolvable:$true] %s44_s15 }
   0xc   :  { %s23_s17 = sshll.u32 %s892_s16, 4  ;;  %s893_s3 = smov [#allocation7]   ;;  %s24_s17 = int_to_ptr.vmem [resolvable:$true] %s23_s17 }
   0xd   :  { %26 = dma.hbm_to_vmem [thread:$0]  %s22_s11, 64, %s24_s17, [#allocation3]  }
   0xe   :  { %s46_s18 = sshll.u32 %s893_s3, 4  ;;  %s70_s0 = sshll.u32 %s957_s4, 4  ;;  %s47_s18 = int_to_ptr.vmem [resolvable:$true] %s46_s18  ;;  %s71_s0 = int_to_ptr.hbm [resolvable:$true] %s70_s0 }
   0xf   :  { %52 = dma.hbm_to_vmem [thread:$0]  %s45_s15, 2048, %s47_s18, [#allocation6], %s890_s1, %s890_s1, %s891_s12  }
  0x10   :  { %s84_s23 = sshll.u32 %s958_s5, 4  ;;  %s894_s24 = smov [#allocation10]   ;;  %s85_s23 = int_to_ptr.hbm [resolvable:$true] %s84_s23 }
  0x11   :  { %s72_s2 = sshll.u32 %s894_s24, 4  ;;  %s895_s25 = smov [#allocation11]   ;;  %s73_s2 = int_to_ptr.vmem [resolvable:$true] %s72_s2 }
  0x12   :  { %78 = dma.hbm_to_vmem [thread:$0]  %s71_s0, 1024, %s73_s2, [#allocation9], %s890_s1, %s890_s1, %s891_s12  }
  0x13   :  { %s86_s26 = sshll.u32 %s895_s25, 4  ;;  %s87_s26 = int_to_ptr.vmem [resolvable:$true] %s86_s26 }
  0x14   :  { %89 = dma.hbm_to_vmem [thread:$0]  %s85_s23, 256, %s87_s26, [#allocation12]  }
  0x15   :  { %876 = dma.done.wait [#allocation3], 64  }
  0x16   :  { %877 = vsyncadd [#allocation3], 4294967232 }
  0x17   :  { %878 = dma.done.wait [#allocation6], 2560  }
  0x18   :  { %879 = vsyncadd [#allocation6], 4294964736 }
  0x19   :  { %880 = dma.done.wait [#allocation9], 2048  }
  0x1a   :  { %881 = vsyncadd [#allocation9], 4294965248 }
  0x1b   :  { %882 = dma.done.wait [#allocation12], 256  }
  0x1c   :  { %883 = vsyncadd [#allocation12], 4294967040  ;;  %v525_v0 = vld [vmem:[#allocation5 + $0x10] sm:$0xf]  ;;  %v664_v1 = vld [vmem:[#allocation5 + $0x14] sm:$0xf0] }
  0x1d   :  { %v663_v2 = vld [vmem:[#allocation5 + $0x14] sm:$0xf]  ;;  %v526_v3 = vor.u32 %v664_v1, %v525_v0  ;;  %v527_v4 = vld [vmem:[#allocation5 + $0x18] sm:$0xf0]  ;;  %v517_v5 = vld [vmem:[#allocation5] sm:$0xf] }
  0x1e   :  { %v662_v6 = vld [vmem:[#allocation5 + $0x4] sm:$0xf0]  ;;  %v530_v7 = vor.u32 %v663_v2, %v527_v4  ;;  %v661_v8 = vld [vmem:[#allocation5 + $0x4] sm:$0xf]  ;;  %v519_v9 = vld [vmem:[#allocation5 + $0x8] sm:$0xf0] }
  0x1f   :  { %154 = vmatpush.bf16.msra.mxu0 %v526_v3  ;;  %v518_v10 = vor.u32 %v662_v6, %v517_v5  ;;  %v672_v11 = vld [vmem:[#allocation7 + $0x38] sm:$0xff]  ;;  %v522_v13 = vor.u32 %v661_v8, %v519_v9  ;;  %v671_v14 = vld [vmem:[#allocation7 + $0x30] sm:$0xff]  ;;  %vm144_vm0 = vcmask 261120   ;;  %v670_v17 = vld [vmem:[#allocation7 + $0x28] sm:$0xff]  ;;  %s896_s4 = smov [#allocation13]   ;;  %s502_s29 = sshll.u32 %s959_s6, 4  ;;  %s503_s29 = int_to_ptr.hbm [resolvable:$true] %s502_s29 }
  0x20   :  { %v680_v12 = vld [vmem:[#allocation7 + $0x78] sm:$0xff]  ;;  %167 = vmatpush.bf16.msra.mxu1 %v530_v7  ;;  %307 = vmatpush.bf16.msra.mxu2 %v672_v11  ;;  %v679_v15 = vld [vmem:[#allocation7 + $0x70] sm:$0xff]  ;;  %v678_v18 = vld [vmem:[#allocation7 + $0x68] sm:$0xff]  ;;  %s500_s5 = sshll.u32 %s896_s4, 4  ;;  %s501_s5 = int_to_ptr.vmem [resolvable:$true] %s500_s5 }
  0x21   :  { %320 = vmatpush.bf16.msra.mxu3 %v680_v12  ;;  %v115_v16 = vld [vmem:[#allocation2] sm:$0xf]  ;;  %v669_v19 = vld [vmem:[#allocation7 + $0x20] sm:$0xff]  ;;  %v667_v23 = vld [vmem:[#allocation7 + $0x10] sm:$0xff] }
  0x22   :  { %v677_v20 = vld [vmem:[#allocation7 + $0x60] sm:$0xff]  ;;  %v668_v21 = vld [vmem:[#allocation7 + $0x18] sm:$0xff]  ;;  %v675_v24 = vld [vmem:[#allocation7 + $0x50] sm:$0xff] }
  0x23   :  { %155 = vmatpush.bf16.msra.mxu0 %v518_v10  ;;  %v676_v22 = vld [vmem:[#allocation7 + $0x58] sm:$0xff]  ;;  %v666_v25 = vld [vmem:[#allocation7 + $0x8] sm:$0xff]  ;;  %v665_v27 = vld [vmem:[#allocation7] sm:$0xff] }
  0x24   :  { %168 = vmatpush.bf16.msra.mxu1 %v522_v13  ;;  %308 = vmatpush.bf16.msra.mxu2 %v671_v14  ;;  %v674_v26 = vld [vmem:[#allocation7 + $0x48] sm:$0xff]  ;;  %v673_v28 = vld [vmem:[#allocation7 + $0x40] sm:$0xff]  ;;  %v688_v29 = vld [vmem:[#allocation8 + $0x38] sm:$0xff] }
  0x25   :  { %321 = vmatpush.bf16.msra.mxu3 %v679_v15  ;;  %v687_v30 = vld [vmem:[#allocation8 + $0x30] sm:$0xff]  ;;  %v686_v31 = vld [vmem:[#allocation8 + $0x28] sm:$0xff]  ;;  %v685_v32 = vld [vmem:[#allocation8 + $0x20] sm:$0xff] }
  0x26   :  { %531 = vmatmul.msk.bf16.vlgmr.msra.gmra.mxu0 %vm144_vm0, %v115_v16  ;;  %v684_v33 = vld [vmem:[#allocation8 + $0x18] sm:$0xff]  ;;  %v116_v34 = vld [vmem:[#allocation11] sm:$0xff]  ;;  %v117_v35 = vld [vmem:[#allocation11 + $0x8] sm:$0xff] }
  0x27   :  { %532 = vmatmul.msk.bf16.vlgmr.msra.gmra.mxu1 %vm144_vm0, %v115_v16  ;;  %400 = vmatpush.bf16.msrb.mxu0 %v688_v29  ;;  %v683_v36 = vld [vmem:[#allocation8 + $0x10] sm:$0xff]  ;;  %v122_v37 = vperm.slane %v116_v34, 0  ;;  %v123_v38 = vperm.slane %v117_v35, 0  ;;  %v682_v49 = vld [vmem:[#allocation8 + $0x8] sm:$0xff]  ;;  %v681_v50 = vld [vmem:[#allocation8] sm:$0xff]  ;;  %v210_v57 = vperm.slane %v116_v34, 1 }
  0x28   :  { %309 = vmatpush.bf16.msra.mxu2 %v670_v17  ;;  %v696_v51 = vld [vmem:[#allocation10 + $0x38] sm:$0xff]  ;;  %v695_v52 = vld [vmem:[#allocation10 + $0x30] sm:$0xff]  ;;  %v694_v53 = vld [vmem:[#allocation10 + $0x28] sm:$0xff]  ;;  %v351_v4 = vperm.slane %v116_v34, 2  ;;  %v431_v10 = vperm.slane %v116_v34, 3 }
  0x29   :  { %322 = vmatpush.bf16.msra.mxu3 %v678_v18  ;;  %480 = vmatpush.bf16.msrb.mxu1 %v696_v51  ;;  %v693_v54 = vld [vmem:[#allocation10 + $0x20] sm:$0xff]  ;;  %v692_v55 = vld [vmem:[#allocation10 + $0x18] sm:$0xff]  ;;  %v691_v56 = vld [vmem:[#allocation10 + $0x10] sm:$0xff] }
  0x2a   :  { %v690_v2 = vld [vmem:[#allocation10 + $0x8] sm:$0xff]  ;;  %v689_v3 = vld [vmem:[#allocation10] sm:$0xff] }
  0x2b   :  { %401 = vmatpush.bf16.msrb.mxu0 %v687_v30 }
  0x2c   :  { %310 = vmatpush.bf16.msra.mxu2 %v669_v19 }
  0x2d   :  { %323 = vmatpush.bf16.msra.mxu3 %v677_v20  ;;  %481 = vmatpush.bf16.msrb.mxu1 %v695_v52 }
  0x2f   :  { %402 = vmatpush.bf16.msrb.mxu0 %v686_v31 }
  0x30   :  { %311 = vmatpush.bf16.msra.mxu2 %v668_v21 }
  0x31   :  { %324 = vmatpush.bf16.msra.mxu3 %v676_v22  ;;  %482 = vmatpush.bf16.msrb.mxu1 %v694_v53 }
  0x33   :  { %403 = vmatpush.bf16.msrb.mxu0 %v685_v32 }
  0x34   :  { %312 = vmatpush.bf16.msra.mxu2 %v667_v23 }
  0x35   :  { %325 = vmatpush.bf16.msra.mxu3 %v675_v24  ;;  %483 = vmatpush.bf16.msrb.mxu1 %v693_v54 }
  0x37   :  { %404 = vmatpush.bf16.msrb.mxu0 %v684_v33 }
  0x38   :  { %313 = vmatpush.bf16.msra.mxu2 %v666_v25 }
  0x39   :  { %326 = vmatpush.bf16.msra.mxu3 %v674_v26  ;;  %484 = vmatpush.bf16.msrb.mxu1 %v692_v55 }
  0x3b   :  { %405 = vmatpush.bf16.msrb.mxu0 %v683_v36 }
  0x3c   :  { %314 = vmatpush.bf16.msra.mxu2 %v665_v27 }
  0x3d   :  { %327 = vmatpush.bf16.msra.mxu3 %v673_v28  ;;  %485 = vmatpush.bf16.msrb.mxu1 %v691_v56 }
  0x3f   :  { %406 = vmatpush.bf16.msrb.mxu0 %v682_v49 }
  0x41   :  { %486 = vmatpush.bf16.msrb.mxu1 %v690_v2 }
  0x43   :  { %407 = vmatpush.bf16.msrb.mxu0 %v681_v50 }
  0x45   :  { %487 = vmatpush.bf16.msrb.mxu1 %v689_v3 }
  0xa3   :  { %v157_v39 = vpop.f32.mrf.mxu0 }
  0xa4   :  { %v158_v40 = vadd.f32 %v157_v39, %v122_v37  ;;  %v170_v41 = vpop.f32.mrf.mxu1 }
  0xa5   :  { %v171_v42 = vadd.f32 %v170_v41, %v123_v38 }
  0xa6   :  { %v174_v43 = vmax.f32 %v158_v40, 0.0 }
  0xa7   :  { %v175_v44 = vmax.f32 %v171_v42, 0.0 }
  0xa8   :  { %v176_v45 = vpack.c.bf16 %v174_v43, %v174_v43 }
  0xa9   :  { %v177_v46 = vpack.c.bf16 %v175_v44, %v175_v44 }
  0xaa   :  { %315 = vmatmul.bf16.vlgmr.msra.gmra.mxu2 %v176_v45 }
  0xab   :  { %328 = vmatmul.bf16.vlgmr.msra.gmra.mxu3 %v177_v46  ;;  %v159_v47 = vpop.f32.mrf.mxu0 }
  0xac   :  { %v172_v48 = vpop.f32.mrf.mxu1 }
 0x12d   :  { %v316_v58 = vpop.f32.mrf.mxu2 }
 0x12e   :  { %v317_v59 = vadd.f32 %v316_v58, %v210_v57  ;;  %v329_v60 = vpop.f32.mrf.mxu3 }
 0x130   :  { %v330_v61 = vadd.f32 %v329_v60, %v317_v59 }
 0x132   :  { %v333_v62 = vmax.f32 %v330_v61, 0.0 }
 0x134   :  { %v334_v63 = vpack.c.bf16 %v333_v62, %v333_v62 }
 0x135   :  { %v318_v0 = vpop.f32.mrf.mxu2 }
 0x136   :  { %v331_v1 = vpop.f32.mrf.mxu3  ;;  %408 = vmatmul.bf16.vlgmr.msrb.gmra.mxu0 %v334_v63 }
 0x1b3   :  { %v409_v5 = vpop.f32.mrf.mxu0 }
 0x1b4   :  { %v410_v6 = vadd.f32 %v409_v5, %v351_v4 }
 0x1b6   :  { %v413_v7 = vmax.f32 %v410_v6, 0.0 }
 0x1b8   :  { %v414_v8 = vpack.c.bf16 %v413_v7, %v413_v7 }
 0x1ba   :  { %488 = vmatmul.bf16.vlgmr.msrb.gmra.mxu1 %v414_v8 }
 0x1bb   :  { %v411_v9 = vpop.f32.mrf.mxu0 }
 0x237   :  { %v489_v11 = vpop.f32.mrf.mxu1 }
 0x238   :  { %v490_v12 = vadd.f32 %v489_v11, %v431_v10 }
 0x23a   :  { %v493_v13 = vpack.c.bf16 %v490_v12, %v490_v12 }
 0x23c   :  { %494 = vst [vmem:[#allocation13] sm:$0xf] %v493_v13 }
 0x23d   :  { %505 = dma.vmem_to_hbm [thread:$0]  %s501_s5, 64, %s503_s29, [#allocation4]  }
 0x23f   :  { %v491_v14 = vpop.f32.mrf.mxu1 }
 0x240   :  { %884 = dma.done.wait [#allocation4], 64  }
 0x241   :  { %885 = vsyncadd [#allocation4], 4294967232 }
 0x242   :  { %510 = vsyncpa [#allocation3], 1 }
 0x243   :  { %511 = vsyncpa [#allocation6], 1 }
 0x244   :  { %512 = vsyncpa [#allocation9], 1 }
 0x245   :  { %513 = vsyncpa [#allocation12], 1 }
 0x246   :  { %514 = vsyncpa [#allocation4], 1 }

</bundles_post_ra>
